<compile_context>
chip_gen: v6e
topology: v6e:2x2x1
jax: 0.10.0
libtpu: 0.0.40
codegen_flags: <defaults>
</compile_context>

<pallas_src>
import functools

import jax
import jax.numpy as jnp
from jax.experimental import pallas as pl
from jax.experimental.pallas import tpu as pltpu

# Tunables --------------------------------------------------------------------
_BLOCK_M_CAP = 2048   # max batch rows per grid step (review: 1024-2048)
_SPLIT_ROWS = 1024    # batches >= this get >= 2 grid steps (v7x has 2 TensorCores)


def _round_up(x, m):
    return ((x + m - 1) // m) * m


def _cdiv(a, b):
    return -(-a // b)


def _batch_blocking(n_rows, unit_single, unit_multi,
                    cap=_BLOCK_M_CAP, split_rows=_SPLIT_ROWS):
    """Pick (block_m, num_blocks) for the batch axis.

    No input padding: grid = cdiv(n_rows, block_m) and the ragged last block reads
    undefined rows / drops OOB writes.  Safe only because rows are independent
    (no cross-row reduction) and the wrapper discards the extra rows -- keep that
    invariant if a batch reduction is ever added.
    """
    n_rows = max(int(n_rows), 1)
    if n_rows < split_rows and n_rows <= cap:
        # Single big block amortizes the ~0.35us per-grid-step cost.
        return _round_up(n_rows, unit_single), 1
    # Large batch: cap the tile and keep >= 2 steps so both v7x TCs get work.
    block_m = min(_round_up(n_rows, unit_multi), _round_up(cap, unit_multi))
    block_m = min(block_m, _round_up(_cdiv(n_rows, 2), unit_multi))
    block_m = max(block_m, unit_multi)
    return block_m, _cdiv(n_rows, block_m)


# ---------------------------------------------------------------------------
# Kernels
# ---------------------------------------------------------------------------

def _make_affine_packed_kernel(pack, logits):
    """Collapsed (active=False) path with lane-packed output.

    Processes the `pack` interleaved row subsets {j, j+pack, ...} of the block and
    writes subset j's logits into lanes [j*logits, (j+1)*logits) of a 128-lane
    output row, so out.reshape(-1, logits) recovers original row order for free.
    """

    def kernel(x_ref, w_ref, b_ref, o_ref):
        rows_out = o_ref.shape[0]
        w = w_ref[...]
        b = b_ref[...].astype(jnp.float32)
        for j in range(pack):                       # static unroll
            xj = x_ref[pl.ds(j, rows_out, stride=pack), :]
            hj = jnp.dot(xj.astype(w.dtype), w,
                         preferred_element_type=jnp.float32) + b
            o_ref[:, j * logits:(j + 1) * logits] = hj.astype(o_ref.dtype)

    return kernel


def _affine_direct_kernel(x_ref, w_ref, b_ref, o_ref):
    """Collapsed path, direct (block_m, logits) output (fallback, still unpadded)."""
    w = w_ref[...]
    h = jnp.dot(x_ref[...].astype(w.dtype), w, preferred_element_type=jnp.float32)
    o_ref[...] = (h + b_ref[...].astype(jnp.float32)).astype(o_ref.dtype)


def _mlp_chunk(h, refs, n_layers):
    """Per-layer math: Linear (+ReLU after every encoder layer, never after mu_l)."""
    for i in range(n_layers):
        w = refs[1 + 2 * i][...]
        b = refs[2 + 2 * i][...].astype(jnp.float32)
        h = jnp.dot(h.astype(w.dtype), w, preferred_element_type=jnp.float32) + b
        if i < n_layers - 1:
            h = jnp.maximum(h, 0.0)
    return h


def _make_mlp_packed_kernel(n_layers, pack, logits):
    def kernel(*refs):
        x_ref, o_ref = refs[0], refs[-1]
        rows_out = o_ref.shape[0]
        for j in range(pack):
            xj = x_ref[pl.ds(j, rows_out, stride=pack), :].astype(jnp.float32)
            hj = _mlp_chunk(xj, refs, n_layers)
            o_ref[:, j * logits:(j + 1) * logits] = hj.astype(o_ref.dtype)

    return kernel


def _make_mlp_direct_kernel(n_layers):
    def kernel(*refs):
        x_ref, o_ref = refs[0], refs[-1]
        h = _mlp_chunk(x_ref[...].astype(jnp.float32), refs, n_layers)
        o_ref[...] = h.astype(o_ref.dtype)

    return kernel


# ---------------------------------------------------------------------------
# pallas_call wrappers
# ---------------------------------------------------------------------------

def _compiler_params():
    return pltpu.CompilerParams(dimension_semantics=("parallel",))


@jax.jit
def _affine_packed_call(x2d, w, b):
    n_rows, n_input = x2d.shape
    logits = w.shape[1]
    pack = 128 // logits
    block_m, num_blocks = _batch_blocking(n_rows, max(8, pack), 8 * pack)
    rows_out = block_m // pack
    out_rows = num_blocks * rows_out

    flops = 2 * num_blocks * block_m * n_input * logits
    bytes_accessed = (n_rows * n_input * x2d.dtype.itemsize
                      + w.size * w.dtype.itemsize + b.size * 4 + out_rows * 512)

    out = pl.pallas_call(
        _make_affine_packed_kernel(pack, logits),
        out_shape=jax.ShapeDtypeStruct((out_rows, pack * logits), jnp.float32),
        grid=(num_blocks,),
        in_specs=[
            pl.BlockSpec((block_m, n_input), lambda i: (i, 0)),
            pl.BlockSpec(w.shape, lambda i: (0, 0)),   # resident weight
            pl.BlockSpec(b.shape, lambda i: (0, 0)),   # resident bias
        ],
        out_specs=pl.BlockSpec((rows_out, pack * logits), lambda i: (i, 0)),
        compiler_params=_compiler_params(),
        cost_estimate=pl.CostEstimate(flops=flops, transcendentals=0,
                                      bytes_accessed=bytes_accessed),
    )(x2d, w, b)

    out = out.reshape(num_blocks * block_m, logits)   # contiguous row-major reshape
    return out[:n_rows] if num_blocks * block_m != n_rows else out


@jax.jit
def _affine_direct_call(x2d, w, b):
    n_rows, n_input = x2d.shape
    logits = w.shape[1]
    block_m, num_blocks = _batch_blocking(n_rows, 8, 8)

    flops = 2 * num_blocks * block_m * n_input * logits
    bytes_accessed = (n_rows * n_input * x2d.dtype.itemsize
                      + w.size * w.dtype.itemsize + b.size * 4 + n_rows * logits * 4)

    return pl.pallas_call(
        _affine_direct_kernel,
        out_shape=jax.ShapeDtypeStruct((n_rows, logits), jnp.float32),
        grid=(num_blocks,),
        in_specs=[
            pl.BlockSpec((block_m, n_input), lambda i: (i, 0)),
            pl.BlockSpec(w.shape, lambda i: (0, 0)),
            pl.BlockSpec(b.shape, lambda i: (0, 0)),
        ],
        out_specs=pl.BlockSpec((block_m, logits), lambda i: (i, 0)),
        compiler_params=_compiler_params(),
        cost_estimate=pl.CostEstimate(flops=flops, transcendentals=0,
                                      bytes_accessed=bytes_accessed),
    )(x2d, w, b)


@jax.jit
def _mlp_packed_call(x2d, *flat):
    n_layers = len(flat) // 2
    n_rows, n_input = x2d.shape
    logits = flat[-2].shape[1]
    pack = 128 // logits
    block_m, num_blocks = _batch_blocking(n_rows, max(8, pack), 8 * pack)
    rows_out = block_m // pack
    out_rows = num_blocks * rows_out

    flops = sum(2 * num_blocks * block_m * flat[2 * i].shape[0] * flat[2 * i].shape[1]
                for i in range(n_layers))
    bytes_accessed = (n_rows * n_input * x2d.dtype.itemsize + out_rows * 512
                      + sum(a.size * a.dtype.itemsize for a in flat))

    in_specs = [pl.BlockSpec((block_m, n_input), lambda i: (i, 0))]
    in_specs += [pl.BlockSpec(a.shape, lambda i: (0, 0)) for a in flat]

    out = pl.pallas_call(
        _make_mlp_packed_kernel(n_layers, pack, logits),
        out_shape=jax.ShapeDtypeStruct((out_rows, pack * logits), jnp.float32),
        grid=(num_blocks,),
        in_specs=in_specs,
        out_specs=pl.BlockSpec((rows_out, pack * logits), lambda i: (i, 0)),
        compiler_params=_compiler_params(),
        cost_estimate=pl.CostEstimate(flops=flops, transcendentals=0,
                                      bytes_accessed=bytes_accessed),
    )(x2d, *flat)

    out = out.reshape(num_blocks * block_m, logits)
    return out[:n_rows] if num_blocks * block_m != n_rows else out


@jax.jit
def _mlp_direct_call(x2d, *flat):
    n_layers = len(flat) // 2
    n_rows, n_input = x2d.shape
    logits = flat[-2].shape[1]
    block_m, num_blocks = _batch_blocking(n_rows, 8, 8)

    flops = sum(2 * num_blocks * block_m * flat[2 * i].shape[0] * flat[2 * i].shape[1]
                for i in range(n_layers))
    bytes_accessed = (n_rows * n_input * x2d.dtype.itemsize + n_rows * logits * 4
                      + sum(a.size * a.dtype.itemsize for a in flat))

    in_specs = [pl.BlockSpec((block_m, n_input), lambda i: (i, 0))]
    in_specs += [pl.BlockSpec(a.shape, lambda i: (0, 0)) for a in flat]

    return pl.pallas_call(
        _make_mlp_direct_kernel(n_layers),
        out_shape=jax.ShapeDtypeStruct((n_rows, logits), jnp.float32),
        grid=(num_blocks,),
        in_specs=in_specs,
        out_specs=pl.BlockSpec((block_m, logits), lambda i: (i, 0)),
        compiler_params=_compiler_params(),
        cost_estimate=pl.CostEstimate(flops=flops, transcendentals=0,
                                      bytes_accessed=bytes_accessed),
    )(x2d, *flat)


@functools.lru_cache(maxsize=1)
def _packed_path_ok():
    """One-time probe: do the strided-load / lane-packed-output kernels lower and
    compute correctly on this backend?  If not, fall back to the direct kernels
    (still unpadded output, still far cheaper than the old 128-lane pad + slice)."""
    try:
        x = jnp.arange(16 * 8, dtype=jnp.float32).reshape(16, 8)
        w = jnp.eye(8, 16, dtype=jnp.float32)
        b = jnp.full((1, 16), 0.5, dtype=jnp.float32)
        got = jax.block_until_ready(_affine_packed_call(x, w, b))
        ref = x @ w + b
        return bool(jnp.allclose(got, ref, atol=1e-5, rtol=1e-5))
    except Exception:
        return False


# ---------------------------------------------------------------------------
# Parameters
# ---------------------------------------------------------------------------

def init_classify_params(key, n_input, inter_dims, logits, dtype=jnp.float32):
    """PyTorch nn.Linear-style uniform init; returns [(W_t (in,out), b (1,out)), ...]."""
    dims = [n_input] + list(inter_dims) + [logits]
    params = []
    for i in range(len(dims) - 1):
        fan_in, fan_out = dims[i], dims[i + 1]
        key, kw, kb = jax.random.split(key, 3)
        bound = 1.0 / (fan_in ** 0.5)
        w_t = jax.random.uniform(kw, (fan_in, fan_out), dtype, -bound, bound)
        b = jax.random.uniform(kb, (1, fan_out), dtype, -bound, bound)
        params.append((w_t, b))
    return params


def prepare_classify_params(params, active=False, weight_dtype=jnp.bfloat16):
    """One-time parameter prep.

    active=False (module default): the Linear chain is a single affine map, folded
    in f32 into ONE (n_input, logits) weight + (1, logits) bias (one MXU matmul,
    one weight DMA).
    active=True : per-layer weights, intermediate hidden dims zero-padded to
    multiples of 128 (lane-dense intermediates; zeros are ReLU/matmul neutral).
    weight_dtype=bfloat16 (default) halves weight DMA and hits the MXU bf16 path;
    biases stay f32, accumulation is f32.  Activations are cast to the weight dtype
    before each matmul, so expect ~1e-2-level diffs vs an f32 reference in bf16 mode.
    """
    logits = int(params[-1][0].shape[1])
    packable = (logits < 128) and (128 % logits == 0)

    if not active:
        w = params[0][0].astype(jnp.float32)
        b = params[0][1].astype(jnp.float32)
        for w_i, b_i in params[1:]:
            b = b @ w_i.astype(jnp.float32) + b_i.astype(jnp.float32)
            w = w @ w_i.astype(jnp.float32)
        return {"mode": "collapsed", "logits": logits, "packable": packable,
                "W": w.astype(weight_dtype), "b": b}

    dims = [int(params[0][0].shape[0])] + [int(w.shape[1]) for w, _ in params]
    pdims = [dims[0]] + [_round_up(d, 128) for d in dims[1:-1]] + [dims[-1]]
    flat = []
    for i, (w, b) in enumerate(params):
        w = jnp.pad(w.astype(jnp.float32),
                    ((0, pdims[i] - dims[i]), (0, pdims[i + 1] - dims[i + 1])))
        b = jnp.pad(b.astype(jnp.float32),
                    ((0, 0), (0, pdims[i + 1] - dims[i + 1])))
        flat += [w.astype(weight_dtype), b]
    return {"mode": "layers", "logits": logits, "packable": packable,
            "flat": tuple(flat)}


# ---------------------------------------------------------------------------
# Forward
# ---------------------------------------------------------------------------

def classify_forward(x, prepared):
    """Classify.forward: torch.squeeze(x) -> encoder Linears -> mu_l Linear."""
    x_sq = jnp.squeeze(x)                    # drops ALL size-1 dims, like torch
    lead_shape = x_sq.shape[:-1]             # Linear acts over the last dim
    x2d = x_sq.reshape(-1, x_sq.shape[-1])
    logits = prepared["logits"]
    use_packed = prepared["packable"] and _packed_path_ok()
    if prepared["mode"] == "collapsed":
        fn = _affine_packed_call if use_packed else _affine_direct_call
        out = fn(x2d, prepared["W"], prepared["b"])
    else:
        fn = _mlp_packed_call if use_packed else _mlp_direct_call
        out = fn(x2d, *prepared["flat"])
    return out.reshape(*lead_shape, logits)


def _reference_forward(x, params, active=False):
    """Pure-JAX reference mirroring the PyTorch module."""
    h = jnp.squeeze(x).astype(jnp.float32)
    n_layers = len(params)
    for i, (w, b) in enumerate(params):
        h = h @ w.astype(jnp.float32) + b.astype(jnp.float32).reshape(-1)
        if active and i < n_layers - 1:
            h = jnp.maximum(h, 0.0)
    return h


if __name__ == "__main__":
    n_input, inter_dims, logits, batch = 32, [64, 64, 128], 16, 8

    key = jax.random.PRNGKey(0)
    key, kx, kx1, kxb = jax.random.split(key, 4)
    # Size-1 dim exercises torch.squeeze semantics.
    x = jax.random.normal(kx, (batch, 1, n_input), dtype=jnp.float32)
    params = init_classify_params(key, n_input, inter_dims, logits)

    # --- active=False, f32 weights: collapsed single-affine kernel, tight check ---
    prep_f32 = prepare_classify_params(params, active=False,
                                       weight_dtype=jnp.float32)
    out = jax.block_until_ready(classify_forward(x, prep_f32))
    ref = _reference_forward(x, params, active=False)
    assert out.shape == (batch, logits), out.shape
    assert jnp.allclose(out, ref, atol=1e-4, rtol=1e-4), "collapsed f32 mismatch"

    # --- batch==1 edge case: torch.squeeze drops the batch dim too ---
    x1 = jax.random.normal(kx1, (1, 1, n_input), dtype=jnp.float32)
    out1 = jax.block_until_ready(classify_forward(x1, prep_f32))
    ref1 = _reference_forward(x1, params, active=False)
    assert out1.shape == (logits,), out1.shape
    assert jnp.allclose(out1, ref1, atol=1e-4, rtol=1e-4), "batch==1 mismatch"

    # --- active=True, f32: per-layer kernel w/ ReLU + 128-padded intermediates ---
    prep_act_f32 = prepare_classify_params(params, active=True,
                                           weight_dtype=jnp.float32)
    out_a = jax.block_until_ready(classify_forward(x, prep_act_f32))
    ref_a = _reference_forward(x, params, active=True)
    assert out_a.shape == (batch, logits), out_a.shape
    assert jnp.allclose(out_a, ref_a, atol=1e-4, rtol=1e-4), "active f32 mismatch"

    # --- bf16 weights (new default): relaxed tolerance (activations cast to bf16) ---
    prep_act_bf16 = prepare_classify_params(params, active=True)
    out_ab = jax.block_until_ready(classify_forward(x, prep_act_bf16))
    assert jnp.allclose(out_ab, ref_a, atol=5e-2, rtol=5e-2), "active bf16 mismatch"

    # --- larger batch: grid > 1 (both v7x TCs), ragged last block, bf16 weights ---
    prep_bf16 = prepare_classify_params(params, active=False)
    xb = jax.random.normal(kxb, (1200, n_input), dtype=jnp.float32)
    out_b = jax.block_until_ready(classify_forward(xb, prep_bf16))
    ref_b = _reference_forward(xb, params, active=False)
    assert out_b.shape == (1200, logits), out_b.shape
    assert jnp.allclose(out_b, ref_b, atol=5e-2, rtol=5e-2), "large-batch mismatch"

    print("KERNEL_OK")
</pallas_src>

<mosaic_0001>
module attributes {stable_mosaic.version = 11 : i64} {
  func.func @kernel(%arg0: i32, %arg1: memref<16x8xf32, #tpu.memory_space<vmem>>, %arg2: memref<8x16xf32, #tpu.memory_space<vmem>>, %arg3: memref<1x16xf32, #tpu.memory_space<vmem>>, %arg4: memref<2x128xf32, #tpu.memory_space<vmem>>) attributes {dimension_semantics = [#tpu.dimension_semantics<parallel>], iteration_bounds = array<i64: 1>, scalar_prefetch = 0 : i64, scratch_operands = 0 : i64, tpu.core_type = #tpu.core_type<tc>, window_params = [{transform_indices = @transform_0, window_bounds = array<i64: 16, 8>}, {pipeline_mode = #tpu.pipeline_mode<synchronous>, transform_indices = @transform_1, window_bounds = array<i64: 8, 16>}, {pipeline_mode = #tpu.pipeline_mode<synchronous>, transform_indices = @transform_2, window_bounds = array<i64: 1, 16>}, {transform_indices = @transform_3, window_bounds = array<i64: 2, 128>}]} {
    %c0 = arith.constant 0 : index
    %c0_0 = arith.constant 0 : index
    %0 = vector.load %arg2[%c0, %c0_0] : memref<8x16xf32, #tpu.memory_space<vmem>>, vector<8x16xf32>
    %c0_1 = arith.constant 0 : index
    %c0_2 = arith.constant 0 : index
    %1 = vector.load %arg3[%c0_1, %c0_2] : memref<1x16xf32, #tpu.memory_space<vmem>>, vector<1x16xf32>
    %c0_3 = arith.constant 0 : index
    %c0_4 = arith.constant 0 : index
    %2 = tpu.strided_load %arg1[%c0_3, %c0_4] {strides = array<i32: 8, 1>} : memref<16x8xf32, #tpu.memory_space<vmem>>, vector<2x8xf32>
    %cst = arith.constant dense<0.000000e+00> : vector<2x16xf32>
    %3 = tpu.matmul %2, %0, %cst {dimension_numbers = #tpu.dot_dimension_numbers<[1], [0], [0], [1], [0, 0, 1, 1], [], []>} : vector<2x8xf32>, vector<8x16xf32>, vector<2x16xf32> -> vector<2x16xf32>
    %4 = vector.broadcast %1 : vector<1x16xf32> to vector<2x16xf32>
    %5 = arith.addf %3, %4 : vector<2x16xf32>
    %c0_5 = arith.constant 0 : index
    %c0_6 = arith.constant 0 : index
    %6 = vector.load %arg4[%c0_5, %c0_6] : memref<2x128xf32, #tpu.memory_space<vmem>>, vector<2x16xf32>
    tpu.vector_store %arg4[%c0_5, %c0_6], %5 {strides = array<i32>} : memref<2x128xf32, #tpu.memory_space<vmem>>, vector<2x16xf32>,
    %c1 = arith.constant 1 : index
    %c0_7 = arith.constant 0 : index
    %7 = tpu.strided_load %arg1[%c1, %c0_7] {strides = array<i32: 8, 1>} : memref<16x8xf32, #tpu.memory_space<vmem>>, vector<2x8xf32>
    %cst_8 = arith.constant dense<0.000000e+00> : vector<2x16xf32>
    %8 = tpu.matmul %7, %0, %cst_8 {dimension_numbers = #tpu.dot_dimension_numbers<[1], [0], [0], [1], [0, 0, 1, 1], [], []>} : vector<2x8xf32>, vector<8x16xf32>, vector<2x16xf32> -> vector<2x16xf32>
    %9 = vector.broadcast %1 : vector<1x16xf32> to vector<2x16xf32>
    %10 = arith.addf %8, %9 : vector<2x16xf32>
    %c0_9 = arith.constant 0 : index
    %c16 = arith.constant 16 : index
    %11 = vector.load %arg4[%c0_9, %c16] : memref<2x128xf32, #tpu.memory_space<vmem>>, vector<2x16xf32>
    tpu.vector_store %arg4[%c0_9, %c16], %10 {strides = array<i32>} : memref<2x128xf32, #tpu.memory_space<vmem>>, vector<2x16xf32>,
    %c2 = arith.constant 2 : index
    %c0_10 = arith.constant 0 : index
    %12 = tpu.strided_load %arg1[%c2, %c0_10] {strides = array<i32: 8, 1>} : memref<16x8xf32, #tpu.memory_space<vmem>>, vector<2x8xf32>
    %cst_11 = arith.constant dense<0.000000e+00> : vector<2x16xf32>
    %13 = tpu.matmul %12, %0, %cst_11 {dimension_numbers = #tpu.dot_dimension_numbers<[1], [0], [0], [1], [0, 0, 1, 1], [], []>} : vector<2x8xf32>, vector<8x16xf32>, vector<2x16xf32> -> vector<2x16xf32>
    %14 = vector.broadcast %1 : vector<1x16xf32> to vector<2x16xf32>
    %15 = arith.addf %13, %14 : vector<2x16xf32>
    %c0_12 = arith.constant 0 : index
    %c32 = arith.constant 32 : index
    %16 = vector.load %arg4[%c0_12, %c32] : memref<2x128xf32, #tpu.memory_space<vmem>>, vector<2x16xf32>
    tpu.vector_store %arg4[%c0_12, %c32], %15 {strides = array<i32>} : memref<2x128xf32, #tpu.memory_space<vmem>>, vector<2x16xf32>,
    %c3 = arith.constant 3 : index
    %c0_13 = arith.constant 0 : index
    %17 = tpu.strided_load %arg1[%c3, %c0_13] {strides = array<i32: 8, 1>} : memref<16x8xf32, #tpu.memory_space<vmem>>, vector<2x8xf32>
    %cst_14 = arith.constant dense<0.000000e+00> : vector<2x16xf32>
    %18 = tpu.matmul %17, %0, %cst_14 {dimension_numbers = #tpu.dot_dimension_numbers<[1], [0], [0], [1], [0, 0, 1, 1], [], []>} : vector<2x8xf32>, vector<8x16xf32>, vector<2x16xf32> -> vector<2x16xf32>
    %19 = vector.broadcast %1 : vector<1x16xf32> to vector<2x16xf32>
    %20 = arith.addf %18, %19 : vector<2x16xf32>
    %c0_15 = arith.constant 0 : index
    %c48 = arith.constant 48 : index
    %21 = vector.load %arg4[%c0_15, %c48] : memref<2x128xf32, #tpu.memory_space<vmem>>, vector<2x16xf32>
    tpu.vector_store %arg4[%c0_15, %c48], %20 {strides = array<i32>} : memref<2x128xf32, #tpu.memory_space<vmem>>, vector<2x16xf32>,
    %c4 = arith.constant 4 : index
    %c0_16 = arith.constant 0 : index
    %22 = tpu.strided_load %arg1[%c4, %c0_16] {strides = array<i32: 8, 1>} : memref<16x8xf32, #tpu.memory_space<vmem>>, vector<2x8xf32>
    %cst_17 = arith.constant dense<0.000000e+00> : vector<2x16xf32>
    %23 = tpu.matmul %22, %0, %cst_17 {dimension_numbers = #tpu.dot_dimension_numbers<[1], [0], [0], [1], [0, 0, 1, 1], [], []>} : vector<2x8xf32>, vector<8x16xf32>, vector<2x16xf32> -> vector<2x16xf32>
    %24 = vector.broadcast %1 : vector<1x16xf32> to vector<2x16xf32>
    %25 = arith.addf %23, %24 : vector<2x16xf32>
    %c0_18 = arith.constant 0 : index
    %c64 = arith.constant 64 : index
    %26 = vector.load %arg4[%c0_18, %c64] : memref<2x128xf32, #tpu.memory_space<vmem>>, vector<2x16xf32>
    tpu.vector_store %arg4[%c0_18, %c64], %25 {strides = array<i32>} : memref<2x128xf32, #tpu.memory_space<vmem>>, vector<2x16xf32>,
    %c5 = arith.constant 5 : index
    %c0_19 = arith.constant 0 : index
    %27 = tpu.strided_load %arg1[%c5, %c0_19] {strides = array<i32: 8, 1>} : memref<16x8xf32, #tpu.memory_space<vmem>>, vector<2x8xf32>
    %cst_20 = arith.constant dense<0.000000e+00> : vector<2x16xf32>
    %28 = tpu.matmul %27, %0, %cst_20 {dimension_numbers = #tpu.dot_dimension_numbers<[1], [0], [0], [1], [0, 0, 1, 1], [], []>} : vector<2x8xf32>, vector<8x16xf32>, vector<2x16xf32> -> vector<2x16xf32>
    %29 = vector.broadcast %1 : vector<1x16xf32> to vector<2x16xf32>
    %30 = arith.addf %28, %29 : vector<2x16xf32>
    %c0_21 = arith.constant 0 : index
    %c80 = arith.constant 80 : index
    %31 = vector.load %arg4[%c0_21, %c80] : memref<2x128xf32, #tpu.memory_space<vmem>>, vector<2x16xf32>
    tpu.vector_store %arg4[%c0_21, %c80], %30 {strides = array<i32>} : memref<2x128xf32, #tpu.memory_space<vmem>>, vector<2x16xf32>,
    %c6 = arith.constant 6 : index
    %c0_22 = arith.constant 0 : index
    %32 = tpu.strided_load %arg1[%c6, %c0_22] {strides = array<i32: 8, 1>} : memref<16x8xf32, #tpu.memory_space<vmem>>, vector<2x8xf32>
    %cst_23 = arith.constant dense<0.000000e+00> : vector<2x16xf32>
    %33 = tpu.matmul %32, %0, %cst_23 {dimension_numbers = #tpu.dot_dimension_numbers<[1], [0], [0], [1], [0, 0, 1, 1], [], []>} : vector<2x8xf32>, vector<8x16xf32>, vector<2x16xf32> -> vector<2x16xf32>
    %34 = vector.broadcast %1 : vector<1x16xf32> to vector<2x16xf32>
    %35 = arith.addf %33, %34 : vector<2x16xf32>
    %c0_24 = arith.constant 0 : index
    %c96 = arith.constant 96 : index
    %36 = vector.load %arg4[%c0_24, %c96] : memref<2x128xf32, #tpu.memory_space<vmem>>, vector<2x16xf32>
    tpu.vector_store %arg4[%c0_24, %c96], %35 {strides = array<i32>} : memref<2x128xf32, #tpu.memory_space<vmem>>, vector<2x16xf32>,
    %c7 = arith.constant 7 : index
    %c0_25 = arith.constant 0 : index
    %37 = tpu.strided_load %arg1[%c7, %c0_25] {strides = array<i32: 8, 1>} : memref<16x8xf32, #tpu.memory_space<vmem>>, vector<2x8xf32>
    %cst_26 = arith.constant dense<0.000000e+00> : vector<2x16xf32>
    %38 = tpu.matmul %37, %0, %cst_26 {dimension_numbers = #tpu.dot_dimension_numbers<[1], [0], [0], [1], [0, 0, 1, 1], [], []>} : vector<2x8xf32>, vector<8x16xf32>, vector<2x16xf32> -> vector<2x16xf32>
    %39 = vector.broadcast %1 : vector<1x16xf32> to vector<2x16xf32>
    %40 = arith.addf %38, %39 : vector<2x16xf32>
    %c0_27 = arith.constant 0 : index
    %c112 = arith.constant 112 : index
    %41 = vector.load %arg4[%c0_27, %c112] : memref<2x128xf32, #tpu.memory_space<vmem>>, vector<2x16xf32>
    tpu.vector_store %arg4[%c0_27, %c112], %40 {strides = array<i32>} : memref<2x128xf32, #tpu.memory_space<vmem>>, vector<2x16xf32>,
    return
  }
  func.func @transform_0(%arg0: i32) -> (i32, i32) {
    %c0_i32 = arith.constant 0 : i32
    %c0_i32_0 = arith.constant 0 : i32
    return %arg0, %c0_i32 : i32, i32
  }
  func.func @transform_1(%arg0: i32) -> (i32, i32) {
    %c0_i32 = arith.constant 0 : i32
    %c0_i32_0 = arith.constant 0 : i32
    %c0_i32_1 = arith.constant 0 : i32
    return %c0_i32, %c0_i32_0 : i32, i32
  }
  func.func @transform_2(%arg0: i32) -> (i32, i32) {
    %c0_i32 = arith.constant 0 : i32
    %c0_i32_0 = arith.constant 0 : i32
    %c0_i32_1 = arith.constant 0 : i32
    return %c0_i32, %c0_i32_0 : i32, i32
  }
  func.func @transform_3(%arg0: i32) -> (i32, i32) {
    %c0_i32 = arith.constant 0 : i32
    %c0_i32_0 = arith.constant 0 : i32
    return %arg0, %c0_i32 : i32, i32
  }
}

module attributes {stable_mosaic.version = 11 : i64} {
  func.func @_affine_direct_kernel(%arg0: i32, %arg1: memref<8x32xf32, #tpu.memory_space<vmem>>, %arg2: memref<32x16xf32, #tpu.memory_space<vmem>>, %arg3: memref<1x16xf32, #tpu.memory_space<vmem>>, %arg4: memref<8x16xf32, #tpu.memory_space<vmem>>) attributes {dimension_semantics = [#tpu.dimension_semantics<parallel>], iteration_bounds = array<i64: 1>, scalar_prefetch = 0 : i64, scratch_operands = 0 : i64, tpu.core_type = #tpu.core_type<tc>, window_params = [{transform_indices = @transform_0, window_bounds = array<i64: 8, 32>}, {pipeline_mode = #tpu.pipeline_mode<synchronous>, transform_indices = @transform_1, window_bounds = array<i64: 32, 16>}, {pipeline_mode = #tpu.pipeline_mode<synchronous>, transform_indices = @transform_2, window_bounds = array<i64: 1, 16>}, {transform_indices = @transform_3, window_bounds = array<i64: 8, 16>}]} {
    %c0 = arith.constant 0 : index
    %c0_0 = arith.constant 0 : index
    %0 = vector.load %arg2[%c0, %c0_0] : memref<32x16xf32, #tpu.memory_space<vmem>>, vector<32x16xf32>
    %c0_1 = arith.constant 0 : index
    %c0_2 = arith.constant 0 : index
    %1 = vector.load %arg1[%c0_1, %c0_2] : memref<8x32xf32, #tpu.memory_space<vmem>>, vector<8x32xf32>
    %cst = arith.constant dense<0.000000e+00> : vector<8x16xf32>
    %2 = tpu.matmul %1, %0, %cst {dimension_numbers = #tpu.dot_dimension_numbers<[1], [0], [0], [1], [0, 0, 1, 1], [], []>} : vector<8x32xf32>, vector<32x16xf32>, vector<8x16xf32> -> vector<8x16xf32>
    %c0_3 = arith.constant 0 : index
    %c0_4 = arith.constant 0 : index
    %3 = vector.load %arg3[%c0_3, %c0_4] : memref<1x16xf32, #tpu.memory_space<vmem>>, vector<1x16xf32>
    %4 = vector.broadcast %3 : vector<1x16xf32> to vector<8x16xf32>
    %5 = arith.addf %2, %4 : vector<8x16xf32>
    %c0_5 = arith.constant 0 : index
    %c0_6 = arith.constant 0 : index
    %6 = vector.load %arg4[%c0_5, %c0_6] : memref<8x16xf32, #tpu.memory_space<vmem>>, vector<8x16xf32>
    tpu.vector_store %arg4[%c0_5, %c0_6], %5 {strides = array<i32>} : memref<8x16xf32, #tpu.memory_space<vmem>>, vector<8x16xf32>,
    return
  }
  func.func @transform_0(%arg0: i32) -> (i32, i32) {
    %c0_i32 = arith.constant 0 : i32
    %c0_i32_0 = arith.constant 0 : i32
    return %arg0, %c0_i32 : i32, i32
  }
  func.func @transform_1(%arg0: i32) -> (i32, i32) {
    %c0_i32 = arith.constant 0 : i32
    %c0_i32_0 = arith.constant 0 : i32
    %c0_i32_1 = arith.constant 0 : i32
    return %c0_i32, %c0_i32_0 : i32, i32
  }
  func.func @transform_2(%arg0: i32) -> (i32, i32) {
    %c0_i32 = arith.constant 0 : i32
    %c0_i32_0 = arith.constant 0 : i32
    %c0_i32_1 = arith.constant 0 : i32
    return %c0_i32, %c0_i32_0 : i32, i32
  }
  func.func @transform_3(%arg0: i32) -> (i32, i32) {
    %c0_i32 = arith.constant 0 : i32
    %c0_i32_0 = arith.constant 0 : i32
    return %arg0, %c0_i32 : i32, i32
  }
}

</mosaic_0001>

<bundles_post_ra>
// kernel: _affine_packed_call.1
= control target key start
LH: loop header
LB: loop body
LE: loop exit
PB: predicated region body
PF: predicated region fallthrough
CT: control target
= control target key end

     0   :  { %v751_v0 = vmov 0.0   ;;  %vm23_vm0 = vcmask 64512   ;;  %vm752_vm1 = vmmov 0   ;;  %vm97_vm2 = vcmask 123904   ;;  %s753_s5 = smov 16   ;;  %s755_s6 = smov 48   ;;  %s850_s1 = inlined_call_operand.vmem [shape: f32[8,16], index: 1, kind: input, shape index: {}]   ;;  %s851_s0 = inlined_call_operand.vmem [shape: f32[16,8], index: 0, kind: input, shape index: {}]   ;;  %s852_s2 = inlined_call_operand.vmem [shape: f32[1,16], index: 2, kind: input, shape index: {}]   ;;  %s853_s3 = inlined_call_operand.vmem [shape: f32[2,128], index: 3, kind: output, shape index: {}]  }
   0x1   :  { %702 = vmatprep.subr.mxu0 %v751_v0  ;;  %707 = vmatprep.subr.mxu1 %v751_v0  ;;  %v14_v1 = vld [vmem:[%s850_s1] sm:$0xff]  ;;  %s756_s7 = smov 64   ;;  %s757_s8 = smov 80   ;;  %vm178_vm3 = vcmask 255104   ;;  %vm259_vm4 = vcmask 386304   ;;  %vm340_vm5 = vcmask 517504  }
   0x2   :  { %v16_v2 = vld [vmem:[%s851_s0] ss:$8 sm:$0x3]  ;;  %703 = vmatpush3.msra.mxu0 %v14_v1  ;;  %704 = vmatprep.mubr.msk.f32.mxu0 %vm752_vm1, %v751_v0  ;;  %v672_v3 = vld [vmem:[%s851_s0 + $0x1] ss:$8 sm:$0x3] }
   0x3   :  { %708 = vmatpush3.msra.mxu1 %v14_v1  ;;  %709 = vmatprep.mubr.msk.f32.mxu1 %vm752_vm1, %v751_v0  ;;  %v674_v4 = vld [vmem:[%s851_s0 + $0x2] ss:$8 sm:$0x3]  ;;  %v676_v5 = vld [vmem:[%s851_s0 + $0x3] ss:$8 sm:$0x3] }
   0x4   :  { %705 = vmatmul.mubr.msk.f32.vlgmr.msra.gmra.mxu0 %vm23_vm0, %v16_v2  ;;  %710 = vmatmul.mubr.msk.f32.vlgmr.msra.gmra.mxu1 %vm23_vm0, %v672_v3  ;;  %v678_v6 = vld [vmem:[%s851_s0 + $0x4] ss:$8 sm:$0x3]  ;;  %v680_v7 = vld [vmem:[%s851_s0 + $0x5] ss:$8 sm:$0x3] }
   0x5   :  { %712 = vmatprep.subr.mxu0 %v751_v0  ;;  %717 = vmatprep.subr.mxu1 %v751_v0  ;;  %v682_v8 = vld [vmem:[%s851_s0 + $0x6] ss:$8 sm:$0x3]  ;;  %v684_v9 = vld [vmem:[%s851_s0 + $0x7] ss:$8 sm:$0x3] }
   0x6   :  { %713 = vmatpush3.msra.mxu0 %v14_v1  ;;  %718 = vmatpush3.msra.mxu1 %v14_v1  ;;  %v670_v10 = vld [vmem:[%s852_s2] ss:$0 sm:$0xff]  ;;  %s754_s2 = smov 32   ;;  %s758_s9 = smov 96   ;;  %vm421_vm6 = vcmask 648704   ;;  %vm502_vm7 = vcmask 779904  }
   0x7   :  { %714 = vmatprep.mubr.msk.f32.mxu0 %vm752_vm1, %v751_v0  ;;  %719 = vmatprep.mubr.msk.f32.mxu1 %vm752_vm1, %v751_v0  ;;  %s759_s10 = smov 112   ;;  %vm583_vm8 = vcmask 911104   ;;  %vm664_vm9 = vcmask 1042304  }
   0x8   :  { %715 = vmatmul.mubr.msk.f32.vlgmr.msra.gmra.mxu0 %vm23_vm0, %v674_v4  ;;  %720 = vmatmul.mubr.msk.f32.vlgmr.msra.gmra.mxu1 %vm23_vm0, %v676_v5 }
   0x9   :  { %722 = vmatprep.subr.mxu0 %v751_v0  ;;  %727 = vmatprep.subr.mxu1 %v751_v0 }
   0xa   :  { %723 = vmatpush3.msra.mxu0 %v14_v1  ;;  %728 = vmatpush3.msra.mxu1 %v14_v1 }
   0xb   :  { %724 = vmatprep.mubr.msk.f32.mxu0 %vm752_vm1, %v751_v0  ;;  %729 = vmatprep.mubr.msk.f32.mxu1 %vm752_vm1, %v751_v0 }
   0xc   :  { %725 = vmatmul.mubr.msk.f32.vlgmr.msra.gmra.mxu0 %vm23_vm0, %v678_v6  ;;  %730 = vmatmul.mubr.msk.f32.vlgmr.msra.gmra.mxu1 %vm23_vm0, %v680_v7 }
   0xd   :  { %732 = vmatprep.subr.mxu0 %v751_v0  ;;  %737 = vmatprep.subr.mxu1 %v751_v0 }
   0xe   :  { %733 = vmatpush3.msra.mxu0 %v14_v1  ;;  %738 = vmatpush3.msra.mxu1 %v14_v1 }
   0xf   :  { %734 = vmatprep.mubr.msk.f32.mxu0 %vm752_vm1, %v751_v0  ;;  %739 = vmatprep.mubr.msk.f32.mxu1 %vm752_vm1, %v751_v0 }
  0x10   :  { %735 = vmatmul.mubr.msk.f32.vlgmr.msra.gmra.mxu0 %vm23_vm0, %v682_v8  ;;  %740 = vmatmul.mubr.msk.f32.vlgmr.msra.gmra.mxu1 %vm23_vm0, %v684_v9 }
  0xc4   :  { %v93_v11 = vpop.f32.mrf.mxu0  ;;  %v170_v12 = vpop.f32.mrf.mxu1 }
  0xc5   :  { %v94_v13 = vadd.f32 %v670_v10, %v93_v11  ;;  %v171_v14 = vadd.f32 %v670_v10, %v170_v12 }
  0xc6   :  { %v706_v15 = vpop.f32.mrf.mxu0  ;;  %v711_v16 = vpop.f32.mrf.mxu1 }
  0xc7   :  { %98 = vst.msk [vmem:[%s853_s3] sm:$0x3] %vm97_vm2, %v94_v13  ;;  %175 = vrot.lane.b32.xlu0 %v171_v14, %s753_s5 }
  0xc8   :  { %v251_v17 = vpop.f32.mrf.mxu0  ;;  %v332_v18 = vpop.f32.mrf.mxu1 }
  0xc9   :  { %v252_v19 = vadd.f32 %v670_v10, %v251_v17  ;;  %v333_v20 = vadd.f32 %v670_v10, %v332_v18 }
  0xca   :  { %v716_v21 = vpop.f32.mrf.mxu0  ;;  %v721_v22 = vpop.f32.mrf.mxu1 }
  0xcb   :  { %256 = vrot.lane.b32.xlu0 %v252_v19, %s754_s2  ;;  %337 = vrot.lane.b32.xlu1 %v333_v20, %s755_s6 }
  0xcc   :  { %v413_v23 = vpop.f32.mrf.mxu0  ;;  %v494_v24 = vpop.f32.mrf.mxu1 }
  0xcd   :  { %v414_v25 = vadd.f32 %v670_v10, %v413_v23  ;;  %v495_v26 = vadd.f32 %v670_v10, %v494_v24 }
  0xce   :  { %v726_v27 = vpop.f32.mrf.mxu0  ;;  %v731_v28 = vpop.f32.mrf.mxu1 }
  0xcf   :  { %418 = vrot.lane.b32.xlu1 %v414_v25, %s756_s7  ;;  %499 = vrot.lane.b32.xlu0 %v495_v26, %s757_s8 }
  0xd0   :  { %v656_v29 = vpop.f32.mrf.mxu1  ;;  %v575_v30 = vpop.f32.mrf.mxu0 }
  0xd1   :  { %v657_v31 = vadd.f32 %v670_v10, %v656_v29  ;;  %v576_v32 = vadd.f32 %v670_v10, %v575_v30 }
  0xd2   :  { %v736_v33 = vpop.f32.mrf.mxu0  ;;  %v741_v34 = vpop.f32.mrf.mxu1 }
  0xd3   :  { %580 = vrot.lane.b32.xlu1 %v576_v32, %s758_s9  ;;  %661 = vrot.lane.b32.xlu0 %v657_v31, %s759_s10 }
 0x139   :  { %v176_v35 = vpop.permute.xlu0 %175 }
 0x13a   :  { %179 = vst.msk [vmem:[%s853_s3] sm:$0x3] %vm178_vm3, %v176_v35 }
 0x13d   :  { %v257_v36 = vpop.permute.xlu0 %256  ;;  %v338_v37 = vpop.permute.xlu1 %337 }
 0x13e   :  { %260 = vst.msk [vmem:[%s853_s3] sm:$0x3] %vm259_vm4, %v257_v36 }
 0x13f   :  { %341 = vst.msk [vmem:[%s853_s3] sm:$0x3] %vm340_vm5, %v338_v37 }
 0x141   :  { %v419_v38 = vpop.permute.xlu1 %418  ;;  %v500_v39 = vpop.permute.xlu0 %499 }
 0x142   :  { %422 = vst.msk [vmem:[%s853_s3] sm:$0x3] %vm421_vm6, %v419_v38 }
 0x143   :  { %503 = vst.msk [vmem:[%s853_s3] sm:$0x3] %vm502_vm7, %v500_v39 }
 0x145   :  { %v581_v40 = vpop.permute.xlu1 %580  ;;  %v662_v41 = vpop.permute.xlu0 %661 }
 0x146   :  { %584 = vst.msk [vmem:[%s853_s3] sm:$0x3] %vm583_vm8, %v581_v40 }
 0x147   :  { %665 = vst.msk [vmem:[%s853_s3] sm:$0x3] %vm664_vm9, %v662_v41 }

// kernel: _affine_direct_call.1
= control target key start
LH: loop header
LB: loop body
LE: loop exit
PB: predicated region body
PF: predicated region fallthrough
CT: control target
= control target key end

     0   :  { %v160_v1 = vmov 0.0   ;;  %vm161_vm0 = vmmov 0   ;;  %s204_s0 = inlined_call_operand.vmem [shape: f32[8,32], index: 0, kind: input, shape index: {}]   ;;  %s205_s1 = inlined_call_operand.vmem [shape: f32[32,16], index: 1, kind: input, shape index: {}]   ;;  %s206_s2 = inlined_call_operand.vmem [shape: f32[1,16], index: 2, kind: input, shape index: {}]   ;;  %s207_s3 = inlined_call_operand.hbm [shape: f32[8,16], index: 3, kind: output, shape index: {}]  }
   0x1   :  { %v18_v0 = vld [vmem:[%s205_s1 + $0x18] sm:$0xff]  ;;  %124 = vmatprep.subr.mxu0 %v160_v1  ;;  %v17_v2 = vld [vmem:[%s205_s1 + $0x10] sm:$0xff]  ;;  %132 = vmatprep.mubr.msk.f32.mxu0 %vm161_vm0, %v160_v1 }
   0x2   :  { %125 = vmatpush3.msra.mxu0 %v18_v0 }
   0x3   :  { %8 = vsyncpa [#allocation3], 0  ;;  %126 = vmatprep.subr.mxu0 %v160_v1  ;;  %v16_v3 = vld [vmem:[%s205_s1 + $0x8] sm:$0xff]  ;;  %v15_v4 = vld [vmem:[%s205_s1] sm:$0xff]  ;;  %vm27_vm1 = vcmask 261120   ;;  %s162_s24 = smov [#allocation2]  }
   0x4   :  { %127 = vmatpush3.msra.mxu0 %v17_v2  ;;  %v19_v5 = vld [vmem:[%s204_s0] sm:$0xff]  ;;  %s109_s25 = sshll.u32 %s162_s24, 4  ;;  %vm101_vm2 = vcmask 130048   ;;  %s110_s25 = int_to_ptr.vmem [resolvable:$true] %s109_s25 }
   0x5   :  { %128 = vmatprep.subr.mxu0 %v160_v1  ;;  %v117_v6 = vld [vmem:[%s206_s2] ss:$0 sm:$0xff]  ;;  %s138_s1 = scalar_lea.vmem %s110_s25, 128  ;;  %p143_p1 = scmp.lt.s32.totalorder %s110_s25, %s110_s25 }
   0x6   :  { %129 = vmatpush3.msra.mxu0 %v16_v3  ;;  %p139_p0 = scmp.ne.s32.totalorder %s110_s25, %s138_s1  ;;  %p144_p2 = scmp.lt.s32.totalorder %s138_s1, %s138_s1 }
   0x7   :  { %130 = vmatprep.subr.mxu0 %v160_v1 }
   0x8   :  { %131 = vmatpush3.msra.mxu0 %v15_v4  ;;  %p145_p3 = por %p144_p2, %p143_p1 }
   0x9   :  { %133 = vmatmul.mubr.msk.f32.vlgmr.msra.gmra.mxu0 %vm27_vm1, %v19_v5 }
   0xa   :  { %p146_p4 = pnand %p145_p3, %p139_p0 }
  0xc9   :  { %v97_v7 = vpop.f32.mrf.mxu0 }
  0xca   :  { %v98_v8 = vadd.f32 %v117_v6, %v97_v7 }
  0xcb   :  { %v134_v9 = vpop.f32.mrf.mxu0 }
  0xcc   :  { %102 = vst.msk [vmem:[#allocation2] sm:$0xff] %vm101_vm2, %v98_v8 }
  0xcd   :  { %149 = shalt.err (!%p146_p4)
}
  0xce   :  { %112 = dma.vmem_to_hbm [thread:$0]  %s110_s25, 128, %s207_s3, [#allocation3]  }
  0xcf   :  { %158 = dma.done.wait [#allocation3], 128  }
  0xd0   :  { %159 = vsyncadd [#allocation3], 4294967168 }
  0xd1   :  { %116 = vsyncpa [#allocation3], 1 }

</bundles_post_ra>
